<compile_context>
chip_gen: v5e
topology: v5e:2x2
jax: 0.10.0
libtpu: 0.0.40
codegen_flags: <defaults>
</compile_context>

<pallas_src>
import jax
import jax.numpy as jnp
from jax import lax
from jax.experimental import pallas as pl
from jax.experimental.pallas import tpu as pltpu

NUM_LANES = 128  # TPU vreg lane width


def _vmem_limit_bytes(fraction=0.75, fallback=48 * 1024 * 1024):
    """Scoped-VMEM limit sized from the actual device (v5e/v6e: 128 MiB
    physical, v7x: 64 MiB) instead of a hard-coded single-generation value."""
    try:
        info = pltpu.get_tpu_info()
        cap = getattr(info, "vmem_capacity_bytes", None)
        if cap:
            return int(cap * fraction)
    except Exception:
        pass
    return fallback


def _lane_tile(x, width):
    """Broadcast a lane-uniform (rows, NUM_LANES) block to (rows, width).

    For `width` a multiple of 128 this is a lane concat (the jnp.tile /
    pltpu.repeat pattern used by the reference flash kernels); otherwise we
    fall back to a single-lane slice + implicit broadcast.
    """
    if width % NUM_LANES == 0:
        reps = width // NUM_LANES
        return x if reps == 1 else jnp.concatenate([x] * reps, axis=-1)
    return x[:, :1]


# ---------------------------------------------------------------------------
# Kernel 1: fused QKV projection — one GEMM  x @ [Wq*scale | Wk | Wv]
# ---------------------------------------------------------------------------
def _qkv_proj_kernel(x_ref, w_ref, qkv_ref):
    # x_ref: (tp, C)   w_ref: (C, 3H)   qkv_ref: (tp, 3H)
    qkv_ref[...] = jnp.dot(
        x_ref[...], w_ref[...], preferred_element_type=jnp.float32
    ).astype(qkv_ref.dtype)


# ---------------------------------------------------------------------------
# Kernel 2: causal flash attention over precomputed Q, K, V
# ---------------------------------------------------------------------------
def _flash_attn_kernel(q_ref, k_ref, v_ref, o_ref, m_scr, l_scr, acc_scr):
    # q_ref: (tq, H) (already scaled by 1/sqrt(H));  k_ref/v_ref: (tkv, H)
    qi = pl.program_id(1)
    ki = pl.program_id(2)

    tq = q_ref.shape[0]
    tkv = k_ref.shape[0]
    h = o_ref.shape[-1]

    # Last kv tile intersecting the causal lower triangle for this q tile.
    last_ki = ((qi + 1) * tq - 1) // tkv

    # --- init online-softmax state once per (batch, q-tile)
    @pl.when(ki == 0)
    def _init():
        m_scr[...] = jnp.full(m_scr.shape, -1e30, dtype=m_scr.dtype)
        l_scr[...] = jnp.zeros(l_scr.shape, dtype=l_scr.dtype)
        acc_scr[...] = jnp.zeros(acc_scr.shape, dtype=acc_scr.dtype)

    # --- kv tiles strictly above the causal diagonal are full no-ops
    #     (their DMAs are also suppressed by the clamped k/v index_map).
    @pl.when(ki <= last_ki)
    def _compute():
        q = q_ref[...]
        k = k_ref[...]
        v = v_ref[...]

        # q @ k^T as a contraction over H (no explicit transpose / relayout).
        s = lax.dot_general(q, k, (((1,), (1,)), ((), ())),
                            preferred_element_type=jnp.float32)  # (tq, tkv)

        # Causal mask; large finite negative avoids inf-inf NaNs.
        row = qi * tq + lax.broadcasted_iota(jnp.int32, (tq, tkv), 0)
        col = ki * tkv + lax.broadcasted_iota(jnp.int32, (tq, tkv), 1)
        s = jnp.where(col <= row, s, -1e30)

        # Online-softmax update, all statistics in f32.  m/l scratch are
        # lane-broadcast (tq, 128) so their loads/stores are full-width.
        m_prev = m_scr[...]                                  # (tq, 128)
        l_prev = l_scr[...]                                  # (tq, 128)
        m_cur = jnp.max(s, axis=-1, keepdims=True)           # (tq, 1)
        m_next = jnp.maximum(m_prev, m_cur)                  # (tq, 128)
        alpha = jnp.exp(m_prev - m_next)                     # (tq, 128)
        p = jnp.exp(s - _lane_tile(m_next, tkv))             # (tq, tkv)
        l_scr[...] = alpha * l_prev + jnp.sum(p, axis=-1, keepdims=True)
        acc_scr[...] = (_lane_tile(alpha, h) * acc_scr[...]
                        + jnp.dot(p.astype(v.dtype), v,
                                  preferred_element_type=jnp.float32))
        m_scr[...] = m_next

    # --- finalize at the diagonal kv tile (not at nk-1) so the trailing
    #     upper-triangular iterations do zero work.
    @pl.when(ki == last_ki)
    def _finalize():
        inv_l = pl.reciprocal(l_scr[...], approx=True)       # (tq, 128)
        o_ref[...] = (acc_scr[...] * _lane_tile(inv_l, h)).astype(o_ref.dtype)


# ---------------------------------------------------------------------------
# Wrapper
# ---------------------------------------------------------------------------
def head_forward(x, w_key, w_query, w_value, *,
                 block_q=128, block_kv=128, block_proj=128,
                 compute_dtype=jnp.bfloat16):
    """Eval-mode forward of the PyTorch `Head` module.

    x: (B, T, C); w_*: (H, C) in PyTorch nn.Linear (out, in) convention.
    On v6e/v7x, block_kv=256 (with block_q=128) is a good choice for large T;
    on v7x pick block_q so that B * (T // block_q) is even for balanced
    megacore shards.
    """
    B, T, C = x.shape
    H = w_key.shape[0]
    scale = float(H) ** -0.5

    tq = min(block_q, T)
    tkv = min(block_kv, T)
    tp = min(block_proj, T)
    assert T % tq == 0 and T % tkv == 0 and T % tp == 0, \
        "sequence length must tile evenly"
    nq, nkv, ntp = T // tq, T // tkv, T // tp

    vmem_limit = _vmem_limit_bytes()

    # bf16 MXU operands; 1/sqrt(H) folded into Wq once (in f32, before the
    # bf16 cast) so neither kernel spends a multiply on it.
    xc = x.astype(compute_dtype)
    w_qkv = jnp.concatenate(
        [w_query.T * scale, w_key.T, w_value.T], axis=1
    ).astype(compute_dtype)                                   # (C, 3H)

    # ---- pass 1: Q/K/V projected exactly once (one fused GEMM per x tile)
    qkv = pl.pallas_call(
        _qkv_proj_kernel,
        out_shape=jax.ShapeDtypeStruct((B, T, 3 * H), compute_dtype),
        grid_spec=pltpu.PrefetchScalarGridSpec(
            num_scalar_prefetch=0,
            grid=(B, ntp),
            in_specs=[
                pl.BlockSpec((None, tp, C), lambda b, t: (b, t, 0)),
                pl.BlockSpec((C, 3 * H), lambda b, t: (0, 0)),
            ],
            out_specs=pl.BlockSpec((None, tp, 3 * H), lambda b, t: (b, t, 0)),
        ),
        compiler_params=pltpu.CompilerParams(
            dimension_semantics=("parallel", "parallel"),
            vmem_limit_bytes=vmem_limit,
        ),
    )(xc, w_qkv)
    q = qkv[..., :H]
    k = qkv[..., H:2 * H]
    v = qkv[..., 2 * H:]

    # ---- pass 2: causal flash attention
    def _q_map(b, qi, ki):
        return (b, qi, 0)

    def _kv_map(b, qi, ki):
        # Clamp to the last in-triangle tile so upper-triangular grid steps
        # reuse the resident block (no DMA issued for skipped tiles).
        last_ki = ((qi + 1) * tq - 1) // tkv
        return (b, jnp.minimum(ki, last_ki), 0)

    # NOTE: for very large nq one could go further and flatten (qi, ki) to a
    # 1-D lower-triangular schedule via scalar-prefetched index tables to
    # remove the ~0.35us/step overhead of the skipped upper-tri iterations.
    return pl.pallas_call(
        _flash_attn_kernel,
        out_shape=jax.ShapeDtypeStruct((B, T, H), x.dtype),
        grid_spec=pltpu.PrefetchScalarGridSpec(
            num_scalar_prefetch=0,
            grid=(B, nq, nkv),
            in_specs=[
                pl.BlockSpec((None, tq, H), _q_map),
                # NOTE: add pipeline_mode=pl.Buffered(3) on the k/v specs only
                # if xprof shows the kv DMA exposed after these fixes.
                pl.BlockSpec((None, tkv, H), _kv_map),
                pl.BlockSpec((None, tkv, H), _kv_map),
            ],
            out_specs=pl.BlockSpec((None, tq, H), _q_map),
            scratch_shapes=[
                pltpu.VMEM((tq, NUM_LANES), jnp.float32),  # running max m
                pltpu.VMEM((tq, NUM_LANES), jnp.float32),  # running denom l
                pltpu.VMEM((tq, H), jnp.float32),          # f32 accumulator
            ],
        ),
        compiler_params=pltpu.CompilerParams(
            dimension_semantics=("parallel", "parallel", "arbitrary"),
            vmem_limit_bytes=vmem_limit,
        ),
    )(q, k, v)


def head_reference(x, w_key, w_query, w_value):
    """Pure-JAX (f32) reference mirroring the PyTorch forward (eval mode)."""
    B, T, C = x.shape
    k = x @ w_key.T
    q = x @ w_query.T
    v = x @ w_value.T
    wei = (q @ jnp.swapaxes(k, -2, -1)) * (k.shape[-1] ** -0.5)
    tril = jnp.tril(jnp.ones((T, T)))
    wei = jnp.where(tril == 0, -jnp.inf, wei)
    wei = jax.nn.softmax(wei, axis=-1)
    return wei @ v


if __name__ == "__main__":
    # --- small shapes consistent with the module (block_size=8, n_embd=32)
    B, T = 2, 8
    n_embd = 32
    head_size = 16

    key = jax.random.PRNGKey(0)
    kx, kk, kq, kv = jax.random.split(key, 4)

    x = jax.random.normal(kx, (B, T, n_embd), dtype=jnp.float32)
    # deterministic "Linear(bias=False)" weights, PyTorch (out, in) convention
    w_key = jax.random.normal(kk, (head_size, n_embd), dtype=jnp.float32) * 0.1
    w_query = jax.random.normal(kq, (head_size, n_embd), dtype=jnp.float32) * 0.1
    w_value = jax.random.normal(kv, (head_size, n_embd), dtype=jnp.float32) * 0.1

    out = jax.block_until_ready(head_forward(x, w_key, w_query, w_value))
    ref = head_reference(x, w_key, w_query, w_value)
    assert out.shape == (B, T, head_size)
    # bf16 MXU operands + approx reciprocal => relaxed tolerance vs f32 ref.
    assert jnp.allclose(out, ref, atol=2e-2, rtol=2e-2), "small-shape mismatch"

    # --- multi-tile check: exercises the clamped kv index_map, the diagonal
    #     finalize, and the cross-tile online softmax (T=256, 128x128 tiles).
    B2, T2, C2 = 2, 256, 64
    kx2, kk2, kq2, kv2 = jax.random.split(jax.random.PRNGKey(0), 4)
    x2 = jax.random.normal(kx2, (B2, T2, C2), dtype=jnp.float32)
    wk2 = jax.random.normal(kk2, (head_size, C2), dtype=jnp.float32) * 0.1
    wq2 = jax.random.normal(kq2, (head_size, C2), dtype=jnp.float32) * 0.1
    wv2 = jax.random.normal(kv2, (head_size, C2), dtype=jnp.float32) * 0.1

    out2 = jax.block_until_ready(
        head_forward(x2, wk2, wq2, wv2, block_q=128, block_kv=128))
    ref2 = head_reference(x2, wk2, wq2, wv2)
    assert out2.shape == (B2, T2, head_size)
    assert jnp.allclose(out2, ref2, atol=3e-2, rtol=3e-2), "multi-tile mismatch"

    print("KERNEL_OK")
</pallas_src>

<mosaic_0001>
module attributes {stable_mosaic.version = 11 : i64} {
  func.func @_qkv_proj_kernel(%arg0: i32, %arg1: i32, %arg2: memref<1x8x32xbf16, #tpu.memory_space<vmem>>, %arg3: memref<32x48xbf16, #tpu.memory_space<vmem>>, %arg4: memref<1x8x48xbf16, #tpu.memory_space<vmem>>) attributes {dimension_semantics = [#tpu.dimension_semantics<parallel>, #tpu.dimension_semantics<parallel>], iteration_bounds = array<i64: 2, 1>, scalar_prefetch = 0 : i64, scratch_operands = 0 : i64, tpu.core_type = #tpu.core_type<tc>, window_params = [{transform_indices = @transform_0, window_bounds = array<i64: 1, 8, 32>}, {pipeline_mode = #tpu.pipeline_mode<synchronous>, transform_indices = @transform_1, window_bounds = array<i64: 32, 48>}, {transform_indices = @transform_2, window_bounds = array<i64: 1, 8, 48>}]} {
    %c0 = arith.constant 0 : index
    %c0_0 = arith.constant 0 : index
    %c0_1 = arith.constant 0 : index
    %0 = vector.load %arg2[%c0, %c0_0, %c0_1] : memref<1x8x32xbf16, #tpu.memory_space<vmem>>, vector<1x8x32xbf16>
    %1 = vector.shape_cast %0 : vector<1x8x32xbf16> to vector<8x32xbf16>
    %c0_2 = arith.constant 0 : index
    %c0_3 = arith.constant 0 : index
    %2 = vector.load %arg3[%c0_2, %c0_3] : memref<32x48xbf16, #tpu.memory_space<vmem>>, vector<32x48xbf16>
    %cst = arith.constant dense<0.000000e+00> : vector<8x48xf32>
    %3 = tpu.matmul %1, %2, %cst {dimension_numbers = #tpu.dot_dimension_numbers<[1], [0], [0], [1], [0, 0, 1, 1], [], []>} : vector<8x32xbf16>, vector<32x48xbf16>, vector<8x48xf32> -> vector<8x48xf32>
    %4 = arith.truncf %3 : vector<8x48xf32> to vector<8x48xbf16>
    %c0_4 = arith.constant 0 : index
    %c0_5 = arith.constant 0 : index
    %c0_6 = arith.constant 0 : index
    %5 = vector.load %arg4[%c0_4, %c0_5, %c0_6] : memref<1x8x48xbf16, #tpu.memory_space<vmem>>, vector<1x8x48xbf16>
    %6 = vector.shape_cast %5 : vector<1x8x48xbf16> to vector<8x48xbf16>
    %7 = vector.shape_cast %4 : vector<8x48xbf16> to vector<1x8x48xbf16>
    tpu.vector_store %arg4[%c0_4, %c0_5, %c0_6], %7 {strides = array<i32>} : memref<1x8x48xbf16, #tpu.memory_space<vmem>>, vector<1x8x48xbf16>,
    return
  }
  func.func @transform_0(%arg0: i32, %arg1: i32) -> (i32, i32, i32) {
    %c0_i32 = arith.constant 0 : i32
    %c0_i32_0 = arith.constant 0 : i32
    return %arg0, %arg1, %c0_i32 : i32, i32, i32
  }
  func.func @transform_1(%arg0: i32, %arg1: i32) -> (i32, i32) {
    %c0_i32 = arith.constant 0 : i32
    %c0_i32_0 = arith.constant 0 : i32
    %c0_i32_1 = arith.constant 0 : i32
    return %c0_i32, %c0_i32_0 : i32, i32
  }
  func.func @transform_2(%arg0: i32, %arg1: i32) -> (i32, i32, i32) {
    %c0_i32 = arith.constant 0 : i32
    %c0_i32_0 = arith.constant 0 : i32
    return %arg0, %arg1, %c0_i32 : i32, i32, i32
  }
}

</mosaic_0001>

<bundles_post_ra>
// kernel: tpu_custom_call.1
= control target key start
LH: loop header
LB: loop body
LE: loop exit
PB: predicated region body
PF: predicated region fallthrough
CT: control target
= control target key end

     0   :  { %7 = vsyncpa [#allocation3], 0  ;;  %s750_s0 = inlined_call_operand.hbm [shape: bf16[2,8,32], index: 0, kind: input, shape index: {}]   ;;  %s751_s1 = inlined_call_operand.hbm [shape: bf16[32,48], index: 1, kind: input, shape index: {}]   ;;  %s752_s2 = inlined_call_operand.hbm [shape: bf16[2,8,48], index: 2, kind: output, shape index: {}]  }
   0x1   :  { %9 = vsyncpa [#allocation3 + $0x1], 0 }
   0x2   :  { %10 = vsyncpa [#allocation6], 0 }
   0x3   :  { %11 = vsyncpa [#allocation4], 0 }
   0x4   :  { %13 = vsyncpa [#allocation4 + $0x1], 0  ;;  %s607_s9 = smov 0   ;;  %s609_s10 = smov 0  }
   0x5   :  { %s611_s11 = smov 0   ;;  %s613_s12 = smov 0  }
   0x6   :  { %s615_s13 = smov 0   ;;  %s617_s14 = smov 0  }
   0x7 LB: > { %s340_s15 = sadd.s32 4294967295, %s587_s14   ;;  %p342_p0 = scmp.ge.s32.totalorder %s587_s14, 1  ;;  %s587_s14 = sphi %s617_s14, %s19_s14   ;;  %s583_s13 = sphi %s615_s13, %s763_s13   ;;  %s579_s12 = sphi %s613_s12, %s762_s12   ;;  %s575_s11 = sphi %s611_s11, %s761_s11   ;;  %s571_s10 = sphi %s609_s10, %s760_s10   ;;  %s567_s9 = sphi %s607_s9, %s759_s9  }
   0x8   : > { %p639_p1 = scmp.eq.s32.totalorder %s340_s15, 0  ;;  %p113_p2 = scmp.lt.s32.totalorder %s587_s14, 3 }
   0x9   : > { %s124_s19 = sshll.u32 %s751_s1, 4  ;;  %s589_s21 = smov [#allocation5]   ;;  %s125_s19 = int_to_ptr.hbm [resolvable:$true] %s124_s19 }
   0xa   : > { %p647_p3 = pnand %p342_p0, %p113_p2  ;;  %s126_s22 = sshll.u32 %s589_s21, 4  ;;  %s127_s22 = int_to_ptr.vmem [resolvable:$true] %s126_s22 }
   0xb   : > { %p344_p6 = scmp.ge.s32.totalorder %s587_s14, 2  ;;  %s590_s23 = smov 64  }
   0xc   : > { %p374_p4 = pneg %p647_p3  ;;  %s591_s24 = smov 4  }
   0xd   : > { %s341_s25 = sadd.s32 4294967294, %s587_s14   ;;  %s31_s26 = sadd.s32 1, %s583_s13 }
   0xe   : > { %p375_p5 = pnand %p374_p4, %p639_p1  ;;  %s40_s27 = sadd.s32 1, %s575_s11 }
   0xf   : > { %p33_p7 = scmp.ge.s32.totalorder %s31_s26, 2  ;;  %p47_p8 = scmp.ne.s32.totalorder %s575_s11, %s571_s10 }
  0x10   : > { %377 = dma.hbm_to_vmem [thread:$0]  (!%p375_p5), %s125_s19, 256, %s127_s22, [#allocation6], %s590_s23, %s590_s23, %s591_s24  }
  0x11   : > { %p48_p9 = scmp.eq.s32.totalorder %s587_s14, 0  ;;  %p53_p10 = scmp.ne.s32.totalorder %s571_s10, %s567_s9 }
  0x12   : > { %s765_s26 = smov (%p33_p7, %s31_s26), 0  ;;  %p100_p13 = scmp.eq.s32.totalorder %s340_s15, 1 }
  0x13   : > { %p666_p11 = por %p48_p9, %p47_p8  ;;  %p672_p12 = por %p639_p1, %p53_p10 }
  0x14   : > { %s35_s30 = ssub.s32 %s583_s13, %s765_s26  ;;  %p106_p2 = scmp.eq.s32.totalorder %s341_s25, 1 }
  0x15   : > { %p38_p0 = scmp.eq.s32.totalorder %s35_s30, 0  ;;  %p678_p4 = por %p100_p13, %p47_p8 }
  0x16   : > { %p387_p5 = scmp.lt.s32.totalorder %s587_s14, 2  ;;  %p686_p7 = por %p106_p2, %p53_p10 }
  0x17   : > { %s684_s4 = scalar_select %p38_p0, %s575_s11, %s40_s27  }
  0x18   : > { %s140_s6 = sand.u32 1, %s575_s11   ;;  %s346_s8 = sshll.u32 %s583_s13, 2 }
  0x19   : > { %s345_s7 = sshll.u32 %s140_s6, 2  ;;  %s149_s15 = scalar_lea.hbm %s750_s0, %s346_s8 }
  0x1a   : > { %s144_s19 = scalar_lea.vmem [#allocation2], %s345_s7  ;;  %s151_s22 = sshll.u32 %s149_s15, 4  ;;  %s152_s22 = int_to_ptr.hbm [resolvable:$true] %s151_s22 }
  0x1b   : > { %s153_s21 = sshll.u32 %s144_s19, 4  ;;  %p379_p8 = pnand %p387_p5, %p666_p11  ;;  %s154_s21 = int_to_ptr.vmem [resolvable:$true] %s153_s21 }
  0x1c   : > { %s141_s23 = scalar_lea.sflag [#allocation3], %s140_s6  ;;  %162 = sbr.rel (%p647_p3) target bundleno = 178 (0xb2), region = 28 }
  0x1d   : > { %381 = dma.hbm_to_vmem [thread:$0]  (!%p379_p8), %s152_s22, 64, %s154_s21, %s141_s23  }
  0x1e   : > { %s700_s24 = sand.u32 (!%p647_p3), 1, %s571_s10  }
  0x1f   : > { %s348_s25 = sshll.u32 (!%p647_p3), %s700_s24, 2  ;;  %s165_s27 = scalar_lea.sflag (!%p647_p3), [#allocation3], %s700_s24 }
  0x20   : > { %s168_s30 = scalar_lea.vmem (!%p647_p3), [#allocation2], %s348_s25 }
  0x21   : > { %554 = dma.done.wait (%p672_p12), %s165_s27, 64  }
  0x22   : > { %556 = vsyncadd (%p672_p12), %s165_s27, 4294967232 }
  0x23   : > { %558 = dma.done.wait (%p639_p1), [#allocation6], 256  }
  0x24   : > { %560 = vsyncadd (%p639_p1), [#allocation6], 4294967040  ;;  %v365_v0 = vld [vmem:[#allocation5 + $0x8] sm:$0xff]  ;;  %v364_v1 = vld [vmem:[#allocation5] sm:$0xff]  ;;  %vm213_vm0 = vcmask 261120   ;;  %s361_s20 = sshll.u32 %s579_s12, 2 }
  0x25   : > { %223 = vmatpush.bf16.msra.mxu0 %v365_v0  ;;  %v196_v2 = vld [vmem:[%s168_s30] sm:$0xf]  ;;  %s245_s29 = scalar_lea.hbm %s752_s2, %s361_s20  ;;  %s194_s7 = scalar_lea.vmem [#allocation7], %s348_s25  ;;  %vm231_vm1 = vcmask 388096  }
  0x26   : > { %s247_s8 = sshll.u32 %s194_s7, 4  ;;  %s249_s17 = sshll.u32 %s245_s29, 4  ;;  %s248_s8 = int_to_ptr.vmem [resolvable:$true] %s247_s8  ;;  %s250_s17 = int_to_ptr.hbm [resolvable:$true] %s249_s17 }
  0x27   : > { %s234_s16 = scalar_lea.sflag [#allocation4], %s700_s24  ;;  %s515_s18 = sshra.s32 %s250_s17, 4  ;;  %s516_s18 = int_to_ptr.hbm [resolvable:$true] %s515_s18 }
  0x28   : > { %s517_s15 = scalar_lea.hbm %s516_s18, 4  ;;  %s521_s21 = scalar_lea.hbm %s752_s2, 8 }
  0x29   : > { %224 = vmatpush.bf16.msra.mxu0 %v364_v1  ;;  %p518_p1 = scmp.ne.s32.totalorder %s516_s18, %s517_s15  ;;  %p522_p10 = scmp.lt.s32.totalorder %s516_s18, %s752_s2 }
  0x2a   : > { %p523_p11 = scmp.lt.s32.totalorder %s521_s21, %s517_s15 }
  0x2b   : > { %p519_p3 = pnand %p518_p1, %p678_p4 }
  0x2c   : > { %359 = vmatmul.msk.bf16.vlgmr.msra.gmra.mxu0 %vm213_vm0, %v196_v2  ;;  %p524_p12 = por %p523_p11, %p522_p10 }
  0x2d   : > { %p520_p9 = pneg %p519_p3 }
  0x2f   : > { %p525_p13 = pnand %p524_p12, %p520_p9 }
  0xa9   : > { %v226_v3 = vpop.f32.mrf.mxu0 }
  0xaa   : > { %v230_v4 = vpack.c.bf16 %v226_v3, %v226_v3 }
  0xac   : > { %232 = vst.msk [vmem:[%s194_s7] sm:$0xf] %vm231_vm1, %v230_v4 }
  0xad   : > { %528 = shalt.err (!%p525_p13)
}
  0xae   : > { %372 = dma.vmem_to_hbm [thread:$0]  (%p678_p4), %s248_s8, 64, %s250_s17, %s234_s16  }
  0xb1   : > { %v228_v5 = vpop.f32.mrf.mxu0 }
  0xb2 PF: > { %s261_s24 = sand.u32 1, %s567_s9   ;;  %p383_p0 = pnand %p344_p6, %p686_p7 }
  0xb3   : > { %s262_s25 = scalar_lea.sflag [#allocation4], %s261_s24 }
  0xb4   : > { %p384_p2 = pneg %p383_p0 }
  0xb6   : > { %562 = dma.done.wait (%p384_p2), %s262_s25, 64  }
  0xb7   : > { %564 = vsyncadd (%p384_p2), %s262_s25, 4294967232  ;;  %s19_s14 = sadd.s32 1, %s587_s14   ;;  %s759_s9 = smov %s571_s10 }
  0xb8   : > { %p16_p5 = scmp.ge.s32.totalorder %s19_s14, 4   ;;  %s760_s10 = smov %s575_s11 }
  0xb9   : > { %s761_s11 = smov %s684_s4  ;;  %s762_s12 = smov %s583_s13 }
  0xba   : > { %s763_s13 = smov %s765_s26  ;;  %18 = sbr.rel (!%p16_p5) target bundleno = 7 (0x7), region = 77 }
  0xbf   :  { %268 = vsyncpa [#allocation3], 1 }
  0xc0   :  { %270 = vsyncpa [#allocation3 + $0x1], 1 }
  0xc1   :  { %271 = vsyncpa [#allocation6], 1 }
  0xc2   :  { %272 = vsyncpa [#allocation4], 1 }
  0xc3   :  { %274 = vsyncpa [#allocation4 + $0x1], 1 }

</bundles_post_ra>
